<compile_context>
chip_gen: v5e
topology: v5e:2x2
jax: 0.10.0
libtpu: 0.0.40
codegen_flags: <defaults>
</compile_context>

<pallas_src>
import jax
import jax.numpy as jnp
from jax.experimental import pallas as pl
from jax.experimental.pallas import tpu as pltpu


def _round_up(a, m):
    return (a + m - 1) // m * m


def _sublane(dtype):
    # rows per packed sublane tile: f32 -> 8, bf16 -> 16, int8/fp8 -> 32.
    return 32 // jnp.dtype(dtype).itemsize


def _vmem_capacity_bytes():
    try:
        info = pltpu.get_tpu_info()
        cap = getattr(info, "vmem_capacity_bytes", None)
        if cap:
            return int(cap)
    except Exception:
        pass
    return 64 * 1024 * 1024  # conservative default (v7x per-TC capacity)


def make_causal_conv1d_kernel(c_in_p, t_tile, halo_blk, kernel_size, dilation,
                              time_axis, compute_dtype):
    pad = (kernel_size - 1) * dilation

    def kernel(xc_ref, xh_ref, w_ref, b_ref, o_ref, col_ref):
        # xc_ref:  (C_in_p, T_TILE)      current time tile of the input
        # xh_ref:  (C_in_p, HALO_BLK)    lane-aligned block just before it
        # w_ref:   (C_out_p, K*C_in_p)   im2col-flattened weight (compute dt)
        # b_ref:   (C_out_p, 1)          f32 bias
        # o_ref:   (C_out_p, T_TILE)
        # col_ref: (K*C_in_p, T_TILE)    im2col scratch (compute dt)
        j = pl.program_id(time_axis)

        # Current-tile contribution of every tap, built straight from the
        # input ref (no intermediate window buffer).
        for k in range(kernel_size):
            off = pad - k * dilation          # columns supplied by the halo
            row = k * c_in_p
            if off == 0:
                col_ref[row:row + c_in_p, :] = xc_ref[...].astype(compute_dtype)
            elif off < t_tile:
                col_ref[row:row + c_in_p, off:] = (
                    xc_ref[:, :t_tile - off].astype(compute_dtype))

        # Causal left context: only the last `pad` columns of the halo block
        # are ever needed; the very first tile has no context -> zeros.
        @pl.when(j == 0)
        def _():
            for k in range(kernel_size):
                off = pad - k * dilation
                if off > 0:
                    col_ref[k * c_in_p:(k + 1) * c_in_p, :off] = jnp.zeros(
                        (c_in_p, off), compute_dtype)

        @pl.when(j > 0)
        def _():
            for k in range(kernel_size):
                off = pad - k * dilation
                if off > 0:
                    col_ref[k * c_in_p:(k + 1) * c_in_p, :off] = (
                        xh_ref[:, halo_blk - off:].astype(compute_dtype))

        # Single MXU contraction over K*C_in_p, accumulated in f32.
        y = jnp.dot(w_ref[...], col_ref[...],
                    preferred_element_type=jnp.float32)
        o_ref[...] = (y + b_ref[...]).astype(o_ref.dtype)

    return kernel


def make_pointwise_conv1d_kernel(compute_dtype):
    # kernel_size == 1: no causal context, no im2col needed.
    def kernel(xc_ref, w_ref, b_ref, o_ref):
        y = jnp.dot(w_ref[...], xc_ref[...].astype(compute_dtype),
                    preferred_element_type=jnp.float32)
        o_ref[...] = (y + b_ref[...]).astype(o_ref.dtype)

    return kernel


def causal_conv1d(x, weight, bias, *, kernel_size, dilation,
                  time_tile=None, compute_dtype=None):
    """Causal dilated 1D conv matching espnet CausalConv1d.forward.

    Args:
      x:      (B, C_in, T)
      weight: (C_out, C_in, K)   (PyTorch Conv1d layout)
      bias:   (C_out,)
      time_tile:     optional time-tile override (auto-sized otherwise)
      compute_dtype: optional staging/matmul dtype (e.g. jnp.bfloat16);
                     defaults to x.dtype.  Accumulation is always f32.
    Returns:
      (B, C_out, T) in x.dtype
    """
    B, C_in, T = x.shape
    C_out, C_in_w, K = weight.shape
    assert C_in_w == C_in and K == kernel_size
    d = dilation
    pad = (K - 1) * d

    x_dtype = x.dtype
    cdt = jnp.dtype(compute_dtype) if compute_dtype is not None else jnp.dtype(x_dtype)
    sub = max(_sublane(x_dtype), _sublane(cdt))
    c_in_p = _round_up(C_in, sub)
    c_out_p = _round_up(C_out, sub)
    dsz_x = jnp.dtype(x_dtype).itemsize
    dsz_c = cdt.itemsize

    halo_blk = _round_up(pad, 128) if pad > 0 else 0
    unit = halo_blk if pad > 0 else 128

    # Larger default tiles when the per-step working set is small.
    if time_tile is None:
        time_tile = 8192 if c_in_p <= 32 else (4096 if c_in_p <= 64 else 2048)
    t_tile = min(_round_up(max(time_tile, unit), unit), _round_up(T, unit))
    t_tile = max(t_tile, unit)

    # --- generation-aware VMEM budget --------------------------------------
    vmem_cap = _vmem_capacity_bytes()
    budget = vmem_cap * 3 // 8            # ~24 MiB (v7x), ~48 MiB (v5e/v6e)
    w_bytes = dsz_c * c_out_p * K * c_in_p + 4 * c_out_p   # resident weight+bias

    def lean_vmem_bytes(tt):
        b = 2 * dsz_x * c_in_p * tt               # current tile (double-buffered)
        b += 2 * dsz_x * c_out_p * tt             # output tile  (double-buffered)
        if pad > 0:
            b += 2 * dsz_x * c_in_p * halo_blk    # halo block   (double-buffered)
            b += dsz_c * K * c_in_p * tt          # im2col scratch
        b += w_bytes                              # weight / bias (resident)
        return b

    while t_tile > unit and lean_vmem_bytes(t_tile) > budget:
        t_tile -= unit

    # Limit scales with the actual footprint (covers a possible extra buffer
    # of the constant weight block + compiler scratch), capped below physical.
    vmem_limit = int(min(int(vmem_cap * 0.9),
                         max(16 * 1024 * 1024,
                             lean_vmem_bytes(t_tile) + w_bytes + (2 << 20))))

    T_padded = _round_up(T, t_tile)
    nj = T_padded // t_tile

    # --- operand preparation -------------------------------------------------
    if T_padded != T or c_in_p != C_in:
        x_in = jnp.pad(x, ((0, 0), (0, c_in_p - C_in), (0, T_padded - T)))
    else:
        x_in = x
    w_p = jnp.pad(weight, ((0, c_out_p - C_out), (0, c_in_p - C_in), (0, 0)))
    # (C_out_p, C_in_p, K) -> (C_out_p, K*C_in_p) with layout [o, k*C_in_p + c].
    w_flat = jnp.transpose(w_p, (0, 2, 1)).reshape(c_out_p, K * c_in_p).astype(cdt)
    bias_p = jnp.pad(bias, (0, c_out_p - C_out)).reshape(c_out_p, 1)
    bias_p = bias_p.astype(jnp.float32)

    # --- grid: put the larger axis first so both v7x TCs get work ------------
    time_major = nj >= B
    grid = (nj, B) if time_major else (B, nj)
    time_axis = 0 if time_major else 1

    if time_major:
        def xmap(j, b): return (b, 0, j)
        def wmap(j, b): return (0, 0)
    else:
        def xmap(b, j): return (b, 0, j)
        def wmap(b, j): return (0, 0)

    in_specs = [pl.BlockSpec((None, c_in_p, t_tile), xmap)]
    operands = [x_in]
    scratch = []

    if pad > 0:
        tb = t_tile // halo_blk
        if time_major:
            def hmap(j, b): return (b, 0, jnp.maximum(j * tb - 1, 0))
        else:
            def hmap(b, j): return (b, 0, jnp.maximum(j * tb - 1, 0))
        in_specs.append(pl.BlockSpec((None, c_in_p, halo_blk), hmap))
        operands.append(x_in)
        scratch.append(pltpu.VMEM((K * c_in_p, t_tile), cdt))
        kernel = make_causal_conv1d_kernel(c_in_p, t_tile, halo_blk, K, d,
                                           time_axis, cdt)
    else:
        kernel = make_pointwise_conv1d_kernel(cdt)

    in_specs += [pl.BlockSpec((c_out_p, K * c_in_p), wmap),
                 pl.BlockSpec((c_out_p, 1), wmap)]
    operands += [w_flat, bias_p]

    out = pl.pallas_call(
        kernel,
        out_shape=jax.ShapeDtypeStruct((B, c_out_p, T_padded), x_dtype),
        grid_spec=pltpu.PrefetchScalarGridSpec(
            num_scalar_prefetch=0,
            grid=grid,
            in_specs=in_specs,
            out_specs=pl.BlockSpec((None, c_out_p, t_tile), xmap),
            scratch_shapes=scratch,
        ),
        compiler_params=pltpu.CompilerParams(
            dimension_semantics=("parallel", "parallel"),
            vmem_limit_bytes=vmem_limit,
        ),
    )(*operands)

    if T_padded != T or c_out_p != C_out:
        out = out[:, :C_out, :T]
    return out


def causal_conv1d_ref(x, weight, bias, *, kernel_size, dilation):
    """Pure-JAX reference (same math as PyTorch Conv1d + right-crop)."""
    B, C_in, T = x.shape
    C_out = weight.shape[0]
    padding = (kernel_size - 1) * dilation
    x_pad = jnp.pad(x, ((0, 0), (0, 0), (padding, 0)))
    y = jnp.zeros((B, C_out, T), jnp.float32)
    for k in range(kernel_size):
        xk = x_pad[:, :, k * dilation:k * dilation + T]       # (B, C_in, T)
        y = y + jnp.einsum('oc,bct->bot', weight[:, :, k], xk)
    return y + bias.reshape(1, C_out, 1)


if __name__ == "__main__":
    B, C_in, C_out = 2, 4, 6
    kernel_size, dilation = 3, 2
    T = 32

    key = jax.random.PRNGKey(0)
    kx, kw, kb = jax.random.split(key, 3)
    x = jax.random.normal(kx, (B, C_in, T), dtype=jnp.float32)
    weight = jax.random.normal(kw, (C_out, C_in, kernel_size), dtype=jnp.float32) * 0.1
    bias = jax.random.normal(kb, (C_out,), dtype=jnp.float32) * 0.1

    # 1) single-tile f32 path
    y = causal_conv1d(x, weight, bias, kernel_size=kernel_size, dilation=dilation)
    y = jax.block_until_ready(y)
    y_ref = causal_conv1d_ref(x, weight, bias, kernel_size=kernel_size, dilation=dilation)
    assert y.shape == (B, C_out, T)
    assert jnp.allclose(y, y_ref, atol=1e-5, rtol=1e-5)

    # 2) multi-tile path (exercises halo fetch for j > 0 and time-major grid)
    T2 = 300
    x2 = jax.random.normal(kx, (B, C_in, T2), dtype=jnp.float32)
    y2 = causal_conv1d(x2, weight, bias, kernel_size=kernel_size,
                       dilation=dilation, time_tile=128)
    y2 = jax.block_until_ready(y2)
    y2_ref = causal_conv1d_ref(x2, weight, bias, kernel_size=kernel_size,
                               dilation=dilation)
    assert y2.shape == (B, C_out, T2)
    assert jnp.allclose(y2, y2_ref, atol=1e-5, rtol=1e-5)

    # 3) bf16 staging/matmul path (f32 accumulation), looser tolerance
    y3 = causal_conv1d(x2, weight, bias, kernel_size=kernel_size,
                       dilation=dilation, time_tile=128,
                       compute_dtype=jnp.bfloat16)
    y3 = jax.block_until_ready(y3)
    assert jnp.allclose(y3, y2_ref, atol=5e-2, rtol=5e-2)

    # 4) kernel_size == 1 (pad == 0) fast path
    w1 = jax.random.normal(kw, (C_out, C_in, 1), dtype=jnp.float32) * 0.1
    y4 = causal_conv1d(x, w1, bias, kernel_size=1, dilation=1)
    y4 = jax.block_until_ready(y4)
    y4_ref = causal_conv1d_ref(x, w1, bias, kernel_size=1, dilation=1)
    assert jnp.allclose(y4, y4_ref, atol=1e-5, rtol=1e-5)

    print("KERNEL_OK")
</pallas_src>

<mosaic_0001>
module attributes {stable_mosaic.version = 11 : i64} {
  func.func @kernel(%arg0: i32, %arg1: i32, %arg2: memref<1x8x128xf32, #tpu.memory_space<vmem>>, %arg3: memref<1x8x128xf32, #tpu.memory_space<vmem>>, %arg4: memref<8x24xf32, #tpu.memory_space<vmem>>, %arg5: memref<8x1xf32, #tpu.memory_space<vmem>>, %arg6: memref<1x8x128xf32, #tpu.memory_space<vmem>>, %arg7: memref<24x128xf32, #tpu.memory_space<vmem>>) attributes {dimension_semantics = [#tpu.dimension_semantics<parallel>, #tpu.dimension_semantics<parallel>], iteration_bounds = array<i64: 2, 1>, scalar_prefetch = 0 : i64, scratch_operands = 1 : i64, tpu.core_type = #tpu.core_type<tc>, window_params = [{transform_indices = @transform_0, window_bounds = array<i64: 1, 8, 128>}, {transform_indices = @transform_1, window_bounds = array<i64: 1, 8, 128>}, {pipeline_mode = #tpu.pipeline_mode<synchronous>, transform_indices = @transform_2, window_bounds = array<i64: 8, 24>}, {pipeline_mode = #tpu.pipeline_mode<synchronous>, transform_indices = @transform_3, window_bounds = array<i64: 8, 1>}, {transform_indices = @transform_4, window_bounds = array<i64: 1, 8, 128>}]} {
    %c0 = arith.constant 0 : index
    %c0_0 = arith.constant 0 : index
    %c0_1 = arith.constant 0 : index
    %0 = vector.load %arg2[%c0, %c0_0, %c0_1] : memref<1x8x128xf32, #tpu.memory_space<vmem>>, vector<1x8x124xf32>
    %1 = vector.shape_cast %0 : vector<1x8x124xf32> to vector<8x124xf32>
    %c0_2 = arith.constant 0 : index
    %c4 = arith.constant 4 : index
    %2 = vector.load %arg7[%c0_2, %c4] : memref<24x128xf32, #tpu.memory_space<vmem>>, vector<8x124xf32>
    tpu.vector_store %arg7[%c0_2, %c4], %1 {strides = array<i32>} : memref<24x128xf32, #tpu.memory_space<vmem>>, vector<8x124xf32>,
    %c0_3 = arith.constant 0 : index
    %c0_4 = arith.constant 0 : index
    %c0_5 = arith.constant 0 : index
    %3 = vector.load %arg2[%c0_3, %c0_4, %c0_5] : memref<1x8x128xf32, #tpu.memory_space<vmem>>, vector<1x8x126xf32>
    %4 = vector.shape_cast %3 : vector<1x8x126xf32> to vector<8x126xf32>
    %c8 = arith.constant 8 : index
    %c2 = arith.constant 2 : index
    %5 = vector.load %arg7[%c8, %c2] : memref<24x128xf32, #tpu.memory_space<vmem>>, vector<8x126xf32>
    tpu.vector_store %arg7[%c8, %c2], %4 {strides = array<i32>} : memref<24x128xf32, #tpu.memory_space<vmem>>, vector<8x126xf32>,
    %c0_6 = arith.constant 0 : index
    %c0_7 = arith.constant 0 : index
    %c0_8 = arith.constant 0 : index
    %6 = vector.load %arg2[%c0_6, %c0_7, %c0_8] : memref<1x8x128xf32, #tpu.memory_space<vmem>>, vector<1x8x128xf32>
    %7 = vector.shape_cast %6 : vector<1x8x128xf32> to vector<8x128xf32>
    %c16 = arith.constant 16 : index
    %c0_9 = arith.constant 0 : index
    %8 = vector.load %arg7[%c16, %c0_9] : memref<24x128xf32, #tpu.memory_space<vmem>>, vector<8x128xf32>
    tpu.vector_store %arg7[%c16, %c0_9], %7 {strides = array<i32>} : memref<24x128xf32, #tpu.memory_space<vmem>>, vector<8x128xf32>,
    %c0_i32 = arith.constant 0 : i32
    %9 = arith.cmpi eq, %arg1, %c0_i32 : i32
    %10 = arith.extui %9 : i1 to i32
    %c0_i32_10 = arith.constant 0 : i32
    %11 = arith.cmpi ne, %10, %c0_i32_10 : i32
    scf.if %11 {
      %cst_22 = arith.constant 0.000000e+00 : f32
      %24 = vector.broadcast %cst_22 : f32 to vector<8x4xf32>
      %c0_23 = arith.constant 0 : index
      %c0_24 = arith.constant 0 : index
      %25 = vector.load %arg7[%c0_23, %c0_24] : memref<24x128xf32, #tpu.memory_space<vmem>>, vector<8x4xf32>
      tpu.vector_store %arg7[%c0_23, %c0_24], %24 {strides = array<i32>} : memref<24x128xf32, #tpu.memory_space<vmem>>, vector<8x4xf32>,
      %cst_25 = arith.constant 0.000000e+00 : f32
      %26 = vector.broadcast %cst_25 : f32 to vector<8x2xf32>
      %c8_26 = arith.constant 8 : index
      %c0_27 = arith.constant 0 : index
      %27 = vector.load %arg7[%c8_26, %c0_27] : memref<24x128xf32, #tpu.memory_space<vmem>>, vector<8x2xf32>
      tpu.vector_store %arg7[%c8_26, %c0_27], %26 {strides = array<i32>} : memref<24x128xf32, #tpu.memory_space<vmem>>, vector<8x2xf32>,
    } else {
    }
    %c0_i32_11 = arith.constant 0 : i32
    %12 = arith.cmpi sgt, %arg1, %c0_i32_11 : i32
    %13 = arith.extui %12 : i1 to i32
    %c0_i32_12 = arith.constant 0 : i32
    %14 = arith.cmpi ne, %13, %c0_i32_12 : i32
    scf.if %14 {
      %c0_22 = arith.constant 0 : index
      %c0_23 = arith.constant 0 : index
      %c124 = arith.constant 124 : index
      %24 = vector.load %arg3[%c0_22, %c0_23, %c124] : memref<1x8x128xf32, #tpu.memory_space<vmem>>, vector<1x8x4xf32>
      %25 = vector.shape_cast %24 : vector<1x8x4xf32> to vector<8x4xf32>
      %c0_24 = arith.constant 0 : index
      %c0_25 = arith.constant 0 : index
      %26 = vector.load %arg7[%c0_24, %c0_25] : memref<24x128xf32, #tpu.memory_space<vmem>>, vector<8x4xf32>
      tpu.vector_store %arg7[%c0_24, %c0_25], %25 {strides = array<i32>} : memref<24x128xf32, #tpu.memory_space<vmem>>, vector<8x4xf32>,
      %c0_26 = arith.constant 0 : index
      %c0_27 = arith.constant 0 : index
      %c126 = arith.constant 126 : index
      %27 = vector.load %arg3[%c0_26, %c0_27, %c126] : memref<1x8x128xf32, #tpu.memory_space<vmem>>, vector<1x8x2xf32>
      %28 = vector.shape_cast %27 : vector<1x8x2xf32> to vector<8x2xf32>
      %c8_28 = arith.constant 8 : index
      %c0_29 = arith.constant 0 : index
      %29 = vector.load %arg7[%c8_28, %c0_29] : memref<24x128xf32, #tpu.memory_space<vmem>>, vector<8x2xf32>
      tpu.vector_store %arg7[%c8_28, %c0_29], %28 {strides = array<i32>} : memref<24x128xf32, #tpu.memory_space<vmem>>, vector<8x2xf32>,
    } else {
    }
    %c0_13 = arith.constant 0 : index
    %c0_14 = arith.constant 0 : index
    %15 = vector.load %arg4[%c0_13, %c0_14] : memref<8x24xf32, #tpu.memory_space<vmem>>, vector<8x24xf32>
    %c0_15 = arith.constant 0 : index
    %c0_16 = arith.constant 0 : index
    %16 = vector.load %arg7[%c0_15, %c0_16] : memref<24x128xf32, #tpu.memory_space<vmem>>, vector<24x128xf32>
    %cst = arith.constant dense<0.000000e+00> : vector<8x128xf32>
    %17 = tpu.matmul %15, %16, %cst {dimension_numbers = #tpu.dot_dimension_numbers<[1], [0], [0], [1], [0, 0, 1, 1], [], []>} : vector<8x24xf32>, vector<24x128xf32>, vector<8x128xf32> -> vector<8x128xf32>
    %c0_17 = arith.constant 0 : index
    %c0_18 = arith.constant 0 : index
    %18 = vector.load %arg5[%c0_17, %c0_18] : memref<8x1xf32, #tpu.memory_space<vmem>>, vector<8x1xf32>
    %19 = vector.broadcast %18 : vector<8x1xf32> to vector<8x128xf32>
    %20 = arith.addf %17, %19 : vector<8x128xf32>
    %c0_19 = arith.constant 0 : index
    %c0_20 = arith.constant 0 : index
    %c0_21 = arith.constant 0 : index
    %21 = vector.load %arg6[%c0_19, %c0_20, %c0_21] : memref<1x8x128xf32, #tpu.memory_space<vmem>>, vector<1x8x128xf32>
    %22 = vector.shape_cast %21 : vector<1x8x128xf32> to vector<8x128xf32>
    %23 = vector.shape_cast %20 : vector<8x128xf32> to vector<1x8x128xf32>
    tpu.vector_store %arg6[%c0_19, %c0_20, %c0_21], %23 {strides = array<i32>} : memref<1x8x128xf32, #tpu.memory_space<vmem>>, vector<1x8x128xf32>,
    return
  }
  func.func @transform_0(%arg0: i32, %arg1: i32) -> (i32, i32, i32) {
    %c0_i32 = arith.constant 0 : i32
    %c0_i32_0 = arith.constant 0 : i32
    return %arg0, %c0_i32, %arg1 : i32, i32, i32
  }
  func.func @transform_1(%arg0: i32, %arg1: i32) -> (i32, i32, i32) {
    %c1_i32 = arith.constant 1 : i32
    %0 = arith.muli %arg1, %c1_i32 : i32
    %c1_i32_0 = arith.constant 1 : i32
    %1 = arith.subi %0, %c1_i32_0 : i32
    %c0_i32 = arith.constant 0 : i32
    %2 = arith.maxsi %1, %c0_i32 : i32
    %c0_i32_1 = arith.constant 0 : i32
    %c0_i32_2 = arith.constant 0 : i32
    return %arg0, %c0_i32_1, %2 : i32, i32, i32
  }
  func.func @transform_2(%arg0: i32, %arg1: i32) -> (i32, i32) {
    %c0_i32 = arith.constant 0 : i32
    %c0_i32_0 = arith.constant 0 : i32
    %c0_i32_1 = arith.constant 0 : i32
    return %c0_i32, %c0_i32_0 : i32, i32
  }
  func.func @transform_3(%arg0: i32, %arg1: i32) -> (i32, i32) {
    %c0_i32 = arith.constant 0 : i32
    %c0_i32_0 = arith.constant 0 : i32
    %c0_i32_1 = arith.constant 0 : i32
    return %c0_i32, %c0_i32_0 : i32, i32
  }
  func.func @transform_4(%arg0: i32, %arg1: i32) -> (i32, i32, i32) {
    %c0_i32 = arith.constant 0 : i32
    %c0_i32_0 = arith.constant 0 : i32
    return %arg0, %c0_i32, %arg1 : i32, i32, i32
  }
}

</mosaic_0001>

<bundles_post_ra>
// kernel: tpu_custom_call.1
= control target key start
LH: loop header
LB: loop body
LE: loop exit
PB: predicated region body
PF: predicated region fallthrough
CT: control target
= control target key end

     0   :  { %9 = vsyncpa [#allocation4], 0  ;;  %s889_s0 = inlined_call_operand.hbm [shape: f32[2,8,128], index: 0, kind: input, shape index: {}]   ;;  %s890_s1 = inlined_call_operand.hbm [shape: f32[2,8,128], index: 1, kind: input, shape index: {}]   ;;  %s891_s2 = inlined_call_operand.vmem [shape: f32[8,24], index: 2, kind: input, shape index: {}]   ;;  %s892_s3 = inlined_call_operand.vmem [shape: f32[8,1], index: 3, kind: input, shape index: {}]   ;;  %s893_s4 = inlined_call_operand.hbm [shape: f32[2,8,128], index: 4, kind: output, shape index: {}]  }
   0x1   :  { %11 = vsyncpa [#allocation4 + $0x1], 0 }
   0x2   :  { %12 = vsyncpa [#allocation7], 0 }
   0x3   :  { %14 = vsyncpa [#allocation7 + $0x1], 0 }
   0x4   :  { %15 = vsyncpa [#allocation5], 0 }
   0x5   :  { %17 = vsyncpa [#allocation5 + $0x1], 0  ;;  %s751_s15 = smov 0   ;;  %s753_s16 = smov 0  }
   0x6   :  { %s755_s17 = smov 0   ;;  %s757_s18 = smov 0  }
   0x7   :  { %s759_s19 = smov 0   ;;  %s761_s20 = smov 0  }
   0x8 LB: > { %s484_s21 = sadd.s32 4294967295, %s720_s20   ;;  %s485_s22 = sadd.s32 4294967294, %s720_s20   ;;  %s720_s20 = sphi %s761_s20, %s23_s20   ;;  %s716_s19 = sphi %s759_s19, %s905_s19   ;;  %s712_s18 = sphi %s757_s18, %s904_s18   ;;  %s708_s17 = sphi %s755_s17, %s903_s17   ;;  %s704_s16 = sphi %s753_s16, %s902_s16   ;;  %s700_s15 = sphi %s751_s15, %s901_s15  }
   0x9   : > { %s35_s23 = sadd.s32 1, %s716_s19  ;;  %s44_s24 = sadd.s32 1, %s708_s17 }
   0xa   : > { %p37_p0 = scmp.ge.s32.totalorder %s35_s23, 2  ;;  %p51_p1 = scmp.ne.s32.totalorder %s708_s17, %s704_s16 }
   0xb   : > { %p52_p2 = scmp.eq.s32.totalorder %s720_s20, 0  ;;  %p57_p3 = scmp.ne.s32.totalorder %s704_s16, %s700_s15 }
   0xc   : > { %s907_s23 = smov (%p37_p0, %s35_s23), 0  ;;  %p58_p5 = scmp.eq.s32.totalorder %s484_s21, 0 }
   0xd   : > { %895 = sst [smem:[#allocation12_spill]] %s907_s23  ;;  %p792_p4 = por %p52_p2, %p51_p1 }
   0xe   : > { %s39_s26 = ssub.s32 %s716_s19, %s907_s23  ;;  %p159_p6 = scmp.eq.s32.totalorder %s484_s21, 1 }
   0xf   : > { %p42_p7 = scmp.eq.s32.totalorder %s39_s26, 0  ;;  %p798_p8 = por %p58_p5, %p57_p3 }
  0x10   : > { %p802_p9 = por %p159_p6, %p51_p1  ;;  %p165_p10 = scmp.eq.s32.totalorder %s485_s22, 1 }
  0x11   : > { %s807_s29 = scalar_select %p42_p7, %s708_s17, %s44_s24  }
  0x12   : > { %p809_p11 = por %p165_p10, %p57_p3  ;;  %p487_p12 = scmp.ge.s32.totalorder %s720_s20, 2 }
  0x13   : > { %p518_p13 = scmp.lt.s32.totalorder %s720_s20, 2  ;;  %s191_s5 = sand.u32 1, %s708_s17  }
  0x14   : > { %s488_s6 = sshll.u32 %s191_s5, 3  ;;  %s489_s7 = sshll.u32 %s716_s19, 3 }
  0x15   : > { %s200_s10 = scalar_lea.hbm %s889_s0, %s489_s7  ;;  %s195_s11 = scalar_lea.vmem [#allocation3], %s488_s6 }
  0x16   : > { %s204_s12 = sshll.u32 %s195_s11, 4  ;;  %s202_s13 = sshll.u32 %s200_s10, 4  ;;  %s205_s12 = int_to_ptr.vmem [resolvable:$true] %s204_s12  ;;  %s203_s13 = int_to_ptr.hbm [resolvable:$true] %s202_s13 }
  0x17   : > { %p508_p0 = pnand %p518_p13, %p792_p4  ;;  %p492_p1 = scmp.ge.s32.totalorder %s720_s20, 1 }
  0x18   : > { %p232_p2 = scmp.lt.s32.totalorder %s720_s20, 3  ;;  %s192_s14 = scalar_lea.sflag [#allocation4], %s191_s5 }
  0x19   : > { %510 = dma.hbm_to_vmem [thread:$0]  (!%p508_p0), %s203_s13, 128, %s205_s12, %s192_s14  }
  0x1a   : > { %p233_p3 = pnand %p492_p1, %p232_p2  ;;  %s223_s24 = scalar_lea.hbm %s890_s1, %s489_s7 }
  0x1b   : > { %s215_s26 = scalar_lea.vmem [#allocation6], %s488_s6  ;;  %s225_s8 = sshll.u32 %s223_s24, 4  ;;  %s226_s8 = int_to_ptr.hbm [resolvable:$true] %s225_s8 }
  0x1c   : > { %s227_s23 = sshll.u32 %s215_s26, 4  ;;  %s212_s9 = scalar_lea.sflag [#allocation7], %s191_s5  ;;  %s228_s23 = int_to_ptr.vmem [resolvable:$true] %s227_s23 }
  0x1d   : > { %513 = dma.hbm_to_vmem [thread:$0]  (!%p508_p0), %s226_s8, 128, %s228_s23, %s212_s9  }
  0x1e   : > { %236 = sbr.rel (%p233_p3) target bundleno = 303 (0x12f), region = 36  ;;  %s828_s25 = sand.u32 (!%p233_p3), 1, %s704_s16  }
  0x1f   : > { %s493_s10 = sshll.u32 (!%p233_p3), %s828_s25, 3  ;;  %s239_s11 = scalar_lea.sflag (!%p233_p3), [#allocation4], %s828_s25 }
  0x20   : > { %s242_s12 = scalar_lea.vmem (!%p233_p3), [#allocation3], %s493_s10 }
  0x23   : > { %687 = dma.done.wait (%p798_p8), %s239_s11, 128  }
  0x24   : > { %689 = vsyncadd (%p798_p8), %s239_s11, 4294967168  ;;  %s249_s23 = scalar_lea.sflag [#allocation7], %s828_s25 }
  0x25   : > { %691 = dma.done.wait (%p798_p8), %s249_s23, 128  }
  0x26   : > { %693 = vsyncadd (%p798_p8), %s249_s23, 4294967168  ;;  %v293_v0 = vld [vmem:[%s242_s12] sm:$0xff]  ;;  %s722_s5 = smov 2   ;;  %s723_s6 = smov 4   ;;  %v724_v2 = vmov 0   ;;  %vm298_vm0 = vcmask 1047568  }
  0x27   : > { %295 = vrot.lane.b32.xlu0 %v293_v0, %s722_s5  ;;  %355 = vmatpush.msra.mxu0 %v293_v0  ;;  %v332_v1 = vld [vmem:[%s892_s3] sm:$0xff]  ;;  %vm308_vm1 = vcmask 15360   ;;  %v725_v4 = vmov 0.0   ;;  %vm291_vm2 = vcmask 1047584   ;;  %vm306_vm3 = vcmask 31744   ;;  %s498_s21 = sshll.u32 %s712_s18, 3 }
  0x28   : > { %572 = vset.pattern.permute.xlu1 %v724_v2  ;;  %573 = vset.pattern.permute.xlu0 %v724_v2  ;;  %v328_v7 = vld [vmem:[%s891_s2] sm:$0xff]  ;;  %vm338_vm4 = vcmask 195584   ;;  %s375_s26 = scalar_lea.hbm %s893_s4, %s498_s21  ;;  %s282_s8 = scalar_lea.vmem [#allocation8], %s493_s10 }
  0x29   : > { %335 = vperm.xlu1 %572, %v332_v1   ;;  %s377_s9 = sshll.u32 %s282_s8, 4  ;;  %s379_s11 = sshll.u32 %s375_s26, 4  ;;  %s378_s9 = int_to_ptr.vmem [resolvable:$true] %s377_s9  ;;  %s380_s11 = int_to_ptr.hbm [resolvable:$true] %s379_s11 }
  0x2a   : > { %s364_s12 = scalar_lea.sflag [#allocation5], %s828_s25  ;;  %s648_s23 = sshra.s32 %s380_s11, 4  ;;  %s649_s23 = int_to_ptr.hbm [resolvable:$true] %s648_s23 }
  0x2b   : > { %s650_s5 = scalar_lea.hbm %s649_s23, 8  ;;  %s654_s7 = scalar_lea.hbm %s893_s4, 16 }
  0x2c   : > { %p651_p4 = scmp.ne.s32.totalorder %s649_s23, %s650_s5  ;;  %p655_p7 = scmp.lt.s32.totalorder %s649_s23, %s893_s4 }
  0x2d   : > { %p656_p8 = scmp.lt.s32.totalorder %s654_s7, %s650_s5 }
  0x2e   : > { %p652_p5 = pnand %p651_p4, %p802_p9 }
  0x2f   : > { %288 = vrot.lane.b32.xlu0 %v293_v0, %s723_s6  ;;  %p657_p10 = por %p656_p8, %p655_p7 }
  0x30   : > { %p653_p6 = pneg %p652_p5 }
  0x32   : > { %p658_p13 = pnand %p657_p10, %p653_p6 }
  0x99   : > { %v296_v3 = vpop.permute.xlu0 %295 }
  0x9a   : > { %299 = vst.msk [vmem:[#allocation2 + $0x8] sm:$0xff] %vm298_vm0, %v296_v3 }
  0x9b   : > { %309 = vst.msk [vmem:[#allocation2 + $0x8] sm:$0xff] %vm308_vm1, %v725_v4  ;;  %v336_v9 = vpop.permute.xlu1 %335 }
  0xa1   : > { %v289_v5 = vpop.permute.xlu0 %288 }
  0xa2   : > { %292 = vst.msk [vmem:[#allocation2] sm:$0xff] %vm291_vm2, %v289_v5  ;;  %v330_v6 = vld [vmem:[#allocation2 + $0x8] sm:$0xff] }
  0xa3   : > { %307 = vst.msk [vmem:[#allocation2] sm:$0xff] %vm306_vm3, %v725_v4  ;;  %356 = vmatpush.msra.mxu0 %v330_v6 }
  0xaa   : > { %v329_v8 = vld [vmem:[#allocation2] sm:$0xff] }
  0xab   : > { %357 = vmatpush.msra.mxu0 %v329_v8 }
  0xac   : > { %496 = vmatmul.msk.f32.vlgmr.msra.gmra.mxu0 %vm338_vm4, %v328_v7 }
 0x129   : > { %v359_v10 = vpop.f32.mrf.mxu0 }
 0x12a   : > { %v360_v11 = vadd.f32 %v359_v10, %v336_v9 }
 0x12c   : > { %362 = vst [vmem:[%s282_s8] sm:$0xff] %v360_v11 }
 0x12d   : > { %661 = shalt.err (!%p658_p13)
}
 0x12e   : > { %505 = dma.vmem_to_hbm [thread:$0]  (%p802_p9), %s378_s9, 128, %s380_s11, %s364_s12  }
 0x12f PF: > { %s391_s25 = sand.u32 1, %s700_s15   ;;  %p515_p0 = pnand %p487_p12, %p809_p11 }
 0x130   : > { %s392_s27 = scalar_lea.sflag [#allocation5], %s391_s25 }
 0x131   : > { %p516_p1 = pneg %p515_p0 }
 0x133   : > { %695 = dma.done.wait (%p516_p1), %s392_s27, 128  }
 0x134   : > { %697 = vsyncadd (%p516_p1), %s392_s27, 4294967168  ;;  %s23_s20 = sadd.s32 1, %s720_s20   ;;  %s900_s28 = sld [smem:[#allocation12_spill]] }
 0x135   : > { %p20_p2 = scmp.ge.s32.totalorder %s23_s20, 4   ;;  %s901_s15 = smov %s704_s16 }
 0x136   : > { %s902_s16 = smov %s708_s17  ;;  %s903_s17 = smov %s807_s29 }
 0x137   : > { %s904_s18 = smov %s716_s19  ;;  %22 = sbr.rel (!%p20_p2) target bundleno = 8 (0x8), region = 102 }
 0x13a   : > { %s905_s19 = smov %s900_s28 }
 0x13c   :  { %398 = vsyncpa [#allocation4], 1 }
 0x13d   :  { %400 = vsyncpa [#allocation4 + $0x1], 1 }
 0x13e   :  { %401 = vsyncpa [#allocation7], 1 }
 0x13f   :  { %403 = vsyncpa [#allocation7 + $0x1], 1 }
 0x140   :  { %404 = vsyncpa [#allocation5], 1 }
 0x141   :  { %406 = vsyncpa [#allocation5 + $0x1], 1 }

</bundles_post_ra>
